<compile_context>
chip_gen: v7x
topology: tpu7x:2x2x1
jax: 0.10.0
libtpu: 0.0.40
codegen_flags: <defaults>
</compile_context>

<pallas_src>
import functools

import jax
import jax.numpy as jnp
from jax.experimental import pallas as pl
from jax.experimental.pallas import tpu as pltpu


def _round_up(x, m):
    return ((x + m - 1) // m) * m


def _edge_mlp_kernel(x_ref, w1_ref, w2_ref, shift_ref, o_ref, *, negative_slope):
    # x_ref:     (TM, E)    bf16 row tile
    # w1_ref:    (E, mid)   bf16, BN scale pre-folded into columns (resident)
    # w2_ref:    (mid, Cp)  bf16, zero-padded lane-dense (resident)
    # shift_ref: (1, mid)   f32 folded BN shift (resident)
    # o_ref:     (TM, Cp)   f32 lane-dense output tile
    h = jnp.dot(x_ref[...], w1_ref[...], preferred_element_type=jnp.float32)
    h = h + shift_ref[...]                       # folded BN shift (f32)
    h = jnp.where(h >= 0, h, negative_slope * h) # LeakyReLU (f32)
    # TODO(synk): Dropout is identity in eval mode; training-mode dropout
    # (pltpu.prng_random_bits mask) and batch-stats BN are not implemented.
    o_ref[...] = jnp.dot(h.astype(w2_ref.dtype), w2_ref[...],
                         preferred_element_type=jnp.float32).astype(o_ref.dtype)


def edge_mlp_forward(edge_feats, w1, w2, gamma, beta, running_mean, running_var,
                     *, negative_slope=0.2, eps=1e-5, tile_m=512):
    """edge_feats: (B, N, E) float32.  Returns (B, N, C) float32."""
    B, N, E = edge_feats.shape
    mid = w1.shape[0]
    C = w2.shape[0]
    M = B * N

    # Fold BatchNorm (eval mode, running stats) into a per-channel affine.
    scale = gamma / jnp.sqrt(running_var + eps)          # (mid,)
    shift = beta - running_mean * scale                  # (mid,)

    # Fold the BN scale into W1's output channels -> kernel only adds `shift`.
    w1t = (jnp.transpose(w1).astype(jnp.float32)
           * scale[None, :]).astype(jnp.bfloat16)        # (E, mid)

    # Lane-dense output: zero-pad C up to a multiple of 128 on W2^T.
    Cp = _round_up(C, 128)
    w2t = jnp.zeros((mid, Cp), dtype=jnp.bfloat16)
    w2t = w2t.at[:, :C].set(jnp.transpose(w2).astype(jnp.bfloat16))

    shift2d = shift.reshape(1, mid).astype(jnp.float32)

    # Row tiling: TM rows per grid step (multiple of 8); pad M up to TM multiple.
    TM = min(tile_m, _round_up(M, 8))
    Mp = _round_up(M, TM)
    x2d = edge_feats.reshape(M, E).astype(jnp.bfloat16)
    if Mp != M:
        x2d = jnp.pad(x2d, ((0, Mp - M), (0, 0)))

    kernel = functools.partial(_edge_mlp_kernel, negative_slope=negative_slope)

    cost = pl.CostEstimate(
        flops=2 * Mp * (E * mid + mid * Cp),
        transcendentals=0,
        bytes_accessed=2 * (Mp * E + E * mid + mid * Cp) + 4 * (Mp * Cp + mid),
    )

    out2d = pl.pallas_call(
        kernel,
        out_shape=jax.ShapeDtypeStruct((Mp, Cp), jnp.float32),
        grid_spec=pltpu.PrefetchScalarGridSpec(
            num_scalar_prefetch=0,
            grid=(Mp // TM,),
            in_specs=[
                pl.BlockSpec((TM, E), lambda i: (i, 0)),     # x tile (pipelined)
                pl.BlockSpec((E, mid), lambda i: (0, 0)),    # W1^T*scale (resident)
                pl.BlockSpec((mid, Cp), lambda i: (0, 0)),   # W2^T padded (resident)
                pl.BlockSpec((1, mid), lambda i: (0, 0)),    # BN shift (resident)
            ],
            out_specs=pl.BlockSpec((TM, Cp), lambda i: (i, 0)),
        ),
        compiler_params=pltpu.CompilerParams(
            dimension_semantics=("parallel",)),
        cost_estimate=cost,
    )(x2d, w1t, w2t, shift2d)

    return out2d[:M, :C].reshape(B, N, C)


def edge_mlp_reference(edge_feats, w1, w2, gamma, beta, running_mean,
                       running_var, *, negative_slope=0.2, eps=1e-5):
    """Pure-JAX f32 reference matching the PyTorch eval-mode forward."""
    h = jnp.einsum('bne,me->bnm', edge_feats, w1)
    h = (h - running_mean) / jnp.sqrt(running_var + eps) * gamma + beta
    h = jnp.where(h >= 0, h, negative_slope * h)
    return jnp.einsum('bnm,cm->bnc', h, w2)


if __name__ == "__main__":
    # Small, deterministic configuration.
    B, N = 2, 8            # batch, number of edges
    embeddings = 32
    mid = embeddings // 2  # 16
    nRelClasses = 8
    negative_slope = 0.2

    key = jax.random.PRNGKey(0)
    k_x, k_w1, k_w2, k_g, k_b, k_m, k_v = jax.random.split(key, 7)

    edge_feats = jax.random.normal(k_x, (B, N, embeddings), dtype=jnp.float32)

    # Linear weights (PyTorch layout: (out_features, in_features)), no bias.
    w1 = jax.random.normal(k_w1, (mid, embeddings), dtype=jnp.float32) * 0.1
    w2 = jax.random.normal(k_w2, (nRelClasses, mid), dtype=jnp.float32) * 0.1

    # SyncBatchNorm parameters / running stats (deterministic, non-trivial).
    gamma = 1.0 + 0.1 * jax.random.normal(k_g, (mid,), dtype=jnp.float32)
    beta = 0.1 * jax.random.normal(k_b, (mid,), dtype=jnp.float32)
    running_mean = 0.1 * jax.random.normal(k_m, (mid,), dtype=jnp.float32)
    running_var = 1.0 + 0.1 * jnp.abs(jax.random.normal(k_v, (mid,), dtype=jnp.float32))

    out = edge_mlp_forward(edge_feats, w1, w2, gamma, beta,
                           running_mean, running_var,
                           negative_slope=negative_slope)
    out = jax.block_until_ready(out)

    ref = edge_mlp_reference(edge_feats, w1, w2, gamma, beta,
                             running_mean, running_var,
                             negative_slope=negative_slope)
    assert out.shape == (B, N, nRelClasses)
    # bf16 matmul inputs (f32 accumulation) -> loosened tolerance vs f32 ref.
    assert jnp.allclose(out, ref, atol=2e-2, rtol=2e-2), "mismatch vs reference"

    print("KERNEL_OK")
</pallas_src>

<mosaic_0001>
module attributes {stable_mosaic.version = 11 : i64} {
  func.func @_edge_mlp_kernel(%arg0: i32, %arg1: memref<16x32xbf16, #tpu.memory_space<vmem>>, %arg2: memref<32x16xbf16, #tpu.memory_space<vmem>>, %arg3: memref<16x128xbf16, #tpu.memory_space<vmem>>, %arg4: memref<1x16xf32, #tpu.memory_space<vmem>>, %arg5: memref<16x128xf32, #tpu.memory_space<vmem>>) attributes {dimension_semantics = [#tpu.dimension_semantics<parallel>], iteration_bounds = array<i64: 1>, scalar_prefetch = 0 : i64, scratch_operands = 0 : i64, tpu.core_type = #tpu.core_type<tc>, window_params = [{transform_indices = @transform_0, window_bounds = array<i64: 16, 32>}, {pipeline_mode = #tpu.pipeline_mode<synchronous>, transform_indices = @transform_1, window_bounds = array<i64: 32, 16>}, {pipeline_mode = #tpu.pipeline_mode<synchronous>, transform_indices = @transform_2, window_bounds = array<i64: 16, 128>}, {pipeline_mode = #tpu.pipeline_mode<synchronous>, transform_indices = @transform_3, window_bounds = array<i64: 1, 16>}, {transform_indices = @transform_4, window_bounds = array<i64: 16, 128>}]} {
    %c0 = arith.constant 0 : index
    %c0_0 = arith.constant 0 : index
    %0 = vector.load %arg1[%c0, %c0_0] : memref<16x32xbf16, #tpu.memory_space<vmem>>, vector<16x32xbf16>
    %c0_1 = arith.constant 0 : index
    %c0_2 = arith.constant 0 : index
    %1 = vector.load %arg2[%c0_1, %c0_2] : memref<32x16xbf16, #tpu.memory_space<vmem>>, vector<32x16xbf16>
    %cst = arith.constant dense<0.000000e+00> : vector<16x16xf32>
    %2 = tpu.matmul %0, %1, %cst {dimension_numbers = #tpu.dot_dimension_numbers<[1], [0], [0], [1], [0, 0, 1, 1], [], []>} : vector<16x32xbf16>, vector<32x16xbf16>, vector<16x16xf32> -> vector<16x16xf32>
    %c0_3 = arith.constant 0 : index
    %c0_4 = arith.constant 0 : index
    %3 = vector.load %arg4[%c0_3, %c0_4] : memref<1x16xf32, #tpu.memory_space<vmem>>, vector<1x16xf32>
    %4 = vector.broadcast %3 : vector<1x16xf32> to vector<16x16xf32>
    %5 = arith.addf %2, %4 : vector<16x16xf32>
    %cst_5 = arith.constant 0.000000e+00 : f32
    %6 = vector.broadcast %cst_5 : f32 to vector<16x16xf32>
    %7 = arith.cmpf oge, %5, %6 : vector<16x16xf32>
    %cst_6 = arith.constant 2.000000e-01 : f32
    %8 = vector.broadcast %cst_6 : f32 to vector<16x16xf32>
    %9 = arith.mulf %8, %5 : vector<16x16xf32>
    %10 = arith.select %7, %5, %9 : vector<16x16xi1>, vector<16x16xf32>
    %11 = arith.truncf %10 : vector<16x16xf32> to vector<16x16xbf16>
    %c0_7 = arith.constant 0 : index
    %c0_8 = arith.constant 0 : index
    %12 = vector.load %arg3[%c0_7, %c0_8] : memref<16x128xbf16, #tpu.memory_space<vmem>>, vector<16x128xbf16>
    %cst_9 = arith.constant dense<0.000000e+00> : vector<16x128xf32>
    %13 = tpu.matmul %11, %12, %cst_9 {dimension_numbers = #tpu.dot_dimension_numbers<[1], [0], [0], [1], [0, 0, 1, 1], [], []>} : vector<16x16xbf16>, vector<16x128xbf16>, vector<16x128xf32> -> vector<16x128xf32>
    %c0_10 = arith.constant 0 : index
    %c0_11 = arith.constant 0 : index
    %14 = vector.load %arg5[%c0_10, %c0_11] : memref<16x128xf32, #tpu.memory_space<vmem>>, vector<16x128xf32>
    tpu.vector_store %arg5[%c0_10, %c0_11], %13 {strides = array<i32>} : memref<16x128xf32, #tpu.memory_space<vmem>>, vector<16x128xf32>,
    return
  }
  func.func @transform_0(%arg0: i32) -> (i32, i32) {
    %c0_i32 = arith.constant 0 : i32
    %c0_i32_0 = arith.constant 0 : i32
    return %arg0, %c0_i32 : i32, i32
  }
  func.func @transform_1(%arg0: i32) -> (i32, i32) {
    %c0_i32 = arith.constant 0 : i32
    %c0_i32_0 = arith.constant 0 : i32
    %c0_i32_1 = arith.constant 0 : i32
    return %c0_i32, %c0_i32_0 : i32, i32
  }
  func.func @transform_2(%arg0: i32) -> (i32, i32) {
    %c0_i32 = arith.constant 0 : i32
    %c0_i32_0 = arith.constant 0 : i32
    %c0_i32_1 = arith.constant 0 : i32
    return %c0_i32, %c0_i32_0 : i32, i32
  }
  func.func @transform_3(%arg0: i32) -> (i32, i32) {
    %c0_i32 = arith.constant 0 : i32
    %c0_i32_0 = arith.constant 0 : i32
    %c0_i32_1 = arith.constant 0 : i32
    return %c0_i32, %c0_i32_0 : i32, i32
  }
  func.func @transform_4(%arg0: i32) -> (i32, i32) {
    %c0_i32 = arith.constant 0 : i32
    %c0_i32_0 = arith.constant 0 : i32
    return %arg0, %c0_i32 : i32, i32
  }
}

</mosaic_0001>

<bundles_post_ra>
// kernel: tpu_custom_call.1
= control target key start
LH: loop header
LB: loop body
LE: loop exit
PB: predicated region body
PF: predicated region fallthrough
CT: control target
= control target key end

     0   :  { %v231_v1 = vmov 0.0   ;;  %vm232_vm0 = vmmov 0   ;;  %s288_s0 = inlined_call_operand.vmem [shape: bf16[16,32], index: 0, kind: input, shape index: {}]   ;;  %s289_s1 = inlined_call_operand.vmem [shape: bf16[32,16], index: 1, kind: input, shape index: {}]   ;;  %s290_s2 = inlined_call_operand.vmem [shape: bf16[16,128], index: 2, kind: input, shape index: {}]   ;;  %s291_s3 = inlined_call_operand.vmem [shape: f32[1,16], index: 3, kind: input, shape index: {}]   ;;  %s292_s4 = inlined_call_operand.hbm [shape: f32[16,128], index: 4, kind: output, shape index: {}]  }
   0x1   :  { %v203_v0 = vld [vmem:[%s289_s1] sm:$0xff]   ;;  %184 = vmatprep.subr.bf16.mxu0 %v231_v1  ;;  %192 = vmatprep.subr.bf16.mxu1 %v231_v1  ;;  %v204_v2 = vld [vmem:[%s289_s1 + $0x8] sm:$0xff]  }
   0x2   :  { %185 = vmatpush3.bf16.msra.mxu0 %v203_v0  ;;  %188 = vmatprep.mubr.msk.bf16.mxu0 %vm232_vm0, %v231_v1 }
   0x3   :  { %186 = vmatprep.subr.bf16.mxu0 %v231_v1  ;;  %194 = vmatprep.mubr.msk.bf16.mxu1 %vm232_vm0, %v231_v1 }
   0x4   :  { %9 = vsyncpa [#allocation3], 0  ;;  %v205_v3 = vld [vmem:[%s288_s0] sm:$0xff]   ;;  %vm49_vm1 = vcmask 261120   ;;  %vm109_vm4 = vcmask 130048   ;;  %s233_s0 = smov [#allocation2]  }
   0x5   :  { %v206_v4 = vld [vmem:[%s290_s2] sm:$0xff]   ;;  %s161_s1 = sshll.u32 %s233_s0, 4  ;;  %s162_s1 = int_to_ptr.vmem [resolvable:$true] %s161_s1 }
   0x6   :  { %187 = vmatpush3.bf16.msra.mxu0 %v204_v2  ;;  %193 = vmatpush3.bf16.msra.mxu1 %v206_v4  ;;  %v172_v5 = vld [vmem:[%s291_s3] ss:$0 sm:$0xff]  ;;  %s207_s2 = scalar_lea.vmem %s162_s1, 256  ;;  %p212_p1 = scmp.lt.s32.totalorder %s162_s1, %s162_s1 }
   0x7   :  { %p208_p0 = scmp.ne.s32.totalorder %s162_s1, %s207_s2  ;;  %p213_p2 = scmp.lt.s32.totalorder %s207_s2, %s207_s2 }
   0x9   :  { %189 = vmatmul.mubr.msk.bf16.vlgmr.msra.gmra.mrb[0].mxu0 %vm49_vm1, %v205_v3  ;;  %p214_p3 = por %p213_p2, %p212_p1 }
   0xb   :  { %p215_p4 = pnand %p214_p3, %p208_p0 }
  0xdc   :  { %v87_v6 = vpop.f32.mrb[0].mxu0 }
  0xdd   :  { %v88_v7 = vadd.f32 %v172_v5, %v87_v6  ;;  %v190_v8 = vpop.f32.mrb[1].mxu0 }
  0xde   :  { %v90_v9 = vpop.f32.mrb[2].mxu0 }
  0xdf   :  { %v96_v10 = vmul.f32 0.2, %v88_v7  ;;  %v91_v11 = vadd.f32 %v172_v5, %v90_v9  ;;  %v191_v12 = vpop.f32.mrb[3].mxu0  ;;  %vm94_vm2 = vcmp.ge.f32.partialorder %v88_v7, 0.0 }
  0xe1   :  { %vm95_vm3 = vcmp.ge.f32.partialorder %v91_v11, 0.0  ;;  %v97_v13 = vmul.f32 0.2, %v91_v11  ;;  %v98_v14 = vsel %vm94_vm2, %v88_v7, %v96_v10 }
  0xe3   :  { %v99_v15 = vsel %vm95_vm3, %v91_v11, %v97_v13 }
  0xe4   :  { %v100_v16 = vpack.c.bf16 %v99_v15, %v98_v14 }
  0xe6   :  { %195 = vmatmul.mubr.msk.bf16.vlgmr.msra.gmra.mrb[0].mxu1 %vm109_vm4, %v100_v16 }
 0x1b9   :  { %v147_v17 = vpop.f32.mrb[0].mxu1 }
 0x1ba   :  { %154 = vst [vmem:[#allocation2] sm:$0xff] %v147_v17  ;;  %v196_v18 = vpop.f32.mrb[1].mxu1 }
 0x1bb   :  { %v150_v19 = vpop.f32.mrb[2].mxu1 }
 0x1bc   :  { %155 = vst [vmem:[#allocation2 + $0x8] sm:$0xff] %v150_v19  ;;  %v197_v20 = vpop.f32.mrb[3].mxu1 }
 0x1bd   :  { %218 = shalt.err (!%p215_p4)
}
 0x1be   :  { %s219_s26 = scalar_lea.hbm %s292_s4, 256 }
 0x1bf   :  { %p220_p5 = scmp.ne.s32.totalorder %s292_s4, %s219_s26  ;;  %p223_p6 = scmp.lt.u32.totalorder %s219_s26, %s292_s4 }
 0x1c1   :  { %p225_p7 = pnand %p223_p6, %p220_p5 }
 0x1c3   :  { %228 = shalt.err (!%p225_p7)
}
 0x1c4   :  { %s234_s5 = smov 128   ;;  %s235_s6 = smov 8  }
 0x1c5   :  { %167 = dma.vmem_to_hbm [thread:$0]  %s162_s1, 256, %s292_s4, [#allocation3], %s234_s5, %s234_s5, %s235_s6  }
 0x1c6   :  { %229 = dma.done.wait [#allocation3], 256  }
 0x1c7   :  { %230 = vsyncadd [#allocation3], 4294967040 }
 0x1c8   :  { %171 = vsyncpa [#allocation3], 1 }

</bundles_post_ra>
